<compile_context>
chip_gen: v7x
topology: tpu7x:2x2x1
jax: 0.10.0
libtpu: 0.0.40
codegen_flags: <defaults>
</compile_context>

<pallas_src>
import functools

import numpy as np
import jax
import jax.numpy as jnp
from jax.experimental import pallas as pl
from jax.experimental.pallas import tpu as pltpu


# -----------------------------------------------------------------------------
# Kernel 1: tiled projection matmul (the ConvTranspose2d((1, S))).
# -----------------------------------------------------------------------------
def _proj_kernel(x_ref, w_ref, b_ref, o_ref):
    acc = jnp.dot(x_ref[...], w_ref[...], preferred_element_type=jnp.float32)
    o_ref[...] = acc + b_ref[...]


def project_to_steps(x, weight, bias, prediction_steps, *, tm=512, tn=1024):
    """x: (B, Cin, T); weight: (Cin, Cout, S); bias: (Cout,)
    Returns proj_steps: (S, B, T, Cout) float32 (score-kernel layout)."""
    bsz, in_dim, tsz = x.shape
    out_dim = weight.shape[1]
    M = bsz * tsz
    N = out_dim * prediction_steps

    x2d = jnp.transpose(x, (0, 2, 1)).reshape(M, in_dim).astype(jnp.bfloat16)
    # Column order (step, out_channel): the result reshapes to (B, T, S, Cout)
    # so the final transpose only permutes leading axes (lane dim stays put).
    w2d = jnp.transpose(weight, (0, 2, 1)).reshape(in_dim, N).astype(jnp.bfloat16)
    b2d = jnp.tile(bias.astype(jnp.float32), prediction_steps)[None, :]

    tm = M if M <= tm else tm  # tm is a multiple of 8 (or the full extent)
    tn = N if N <= tn else tn  # tn is a multiple of 128 (or the full extent)
    grid = (pl.cdiv(M, tm), pl.cdiv(N, tn))

    flops = 2 * M * N * in_dim
    bytes_accessed = (M * in_dim + in_dim * N) * 2 + (M * N + N) * 4

    out2d = pl.pallas_call(
        _proj_kernel,
        out_shape=jax.ShapeDtypeStruct((M, N), jnp.float32),
        grid=grid,
        in_specs=[
            pl.BlockSpec((tm, in_dim), lambda i, j: (i, 0)),
            pl.BlockSpec((in_dim, tn), lambda i, j: (0, j)),
            pl.BlockSpec((1, tn), lambda i, j: (0, j)),
        ],
        out_specs=pl.BlockSpec((tm, tn), lambda i, j: (i, j)),
        compiler_params=pltpu.CompilerParams(
            dimension_semantics=("parallel", "parallel"),
            vmem_limit_bytes=32 * 1024 * 1024,
        ),
        cost_estimate=pl.CostEstimate(
            flops=flops, transcendentals=0, bytes_accessed=bytes_accessed
        ),
    )(x2d, w2d, b2d)

    proj = out2d.reshape(bsz, tsz, prediction_steps, out_dim)
    return jnp.transpose(proj, (2, 0, 1, 3))  # (S, B, T, Cout)


# -----------------------------------------------------------------------------
# Kernel 2: per-(step, copy) prediction scores
#   scores[i, n, b, t] = sum_c proj[i, b, t, c] * targets_pad[n, b, t+i+offset, c]
# Only one step's projection and one copy's padded targets are VMEM-resident
# per grid point; the time shift is a pl.ds slice; channel reduce is in f32.
# -----------------------------------------------------------------------------
def _score_kernel(proj_ref, tgt_ref, out_ref, *, offset, tsz):
    i = pl.program_id(0)
    tgt = tgt_ref[:, pl.ds(i + offset, tsz), :]            # (B, T, C)
    out_ref[...] = jnp.sum(proj_ref[...] * tgt, axis=-1)   # (B, T) f32


def compute_scores(proj_steps, targets_pad, offset, tsz):
    steps, bsz, _, dim = proj_steps.shape
    copies, _, tsz_pad, _ = targets_pad.shape
    kernel = functools.partial(_score_kernel, offset=offset, tsz=tsz)

    flops = 2 * steps * copies * bsz * tsz * dim
    bytes_accessed = 4 * (
        steps * bsz * tsz * dim
        + steps * copies * bsz * tsz_pad * dim
        + steps * copies * bsz * tsz
    )

    return pl.pallas_call(
        kernel,
        out_shape=jax.ShapeDtypeStruct((steps, copies, bsz, tsz), jnp.float32),
        grid=(steps, copies),
        in_specs=[
            pl.BlockSpec((None, bsz, tsz, dim), lambda i, n: (i, 0, 0, 0)),
            pl.BlockSpec((None, bsz, tsz_pad, dim), lambda i, n: (n, 0, 0, 0)),
        ],
        out_specs=pl.BlockSpec((None, None, bsz, tsz), lambda i, n: (i, n, 0, 0)),
        compiler_params=pltpu.CompilerParams(
            dimension_semantics=("parallel", "parallel"),
            vmem_limit_bytes=48 * 1024 * 1024,
        ),
        cost_estimate=pl.CostEstimate(
            flops=flops, transcendentals=0, bytes_accessed=bytes_accessed
        ),
    )(proj_steps, targets_pad)


# -----------------------------------------------------------------------------
# Glue: negative sampling (mirror of the torch code, jax.random for RNG).
# -----------------------------------------------------------------------------
def sample_negatives(key, y, n_negatives, cross_sample_negatives, sample_distance):
    bsz, fsz, tsz = y.shape
    y_flat = jnp.transpose(y, (1, 0, 2)).reshape(fsz, bsz * tsz)
    cross_high = tsz * bsz
    high = tsz if sample_distance is None else min(tsz, sample_distance)
    assert high > 1
    k1, k2 = jax.random.split(key)

    neg_idxs = None
    if n_negatives > 0:
        tszs = jnp.repeat(jnp.arange(tsz), n_negatives)
        neg_idxs = jax.random.randint(k1, (bsz, n_negatives * tsz), 0, high - 1)
        neg_idxs = jnp.where(neg_idxs >= tszs[None, :], neg_idxs + 1, neg_idxs)
        neg_idxs = neg_idxs + jnp.arange(bsz)[:, None] * high
    if cross_sample_negatives > 0:
        tszs = jnp.repeat(jnp.arange(tsz), cross_sample_negatives)
        cross_neg_idxs = jax.random.randint(
            k2, (bsz, cross_sample_negatives * tsz), 0, cross_high - 1
        )
        cross_neg_idxs = jnp.where(
            cross_neg_idxs >= tszs[None, :], cross_neg_idxs + 1, cross_neg_idxs
        )
        if n_negatives > 0:
            neg_idxs = jnp.concatenate([neg_idxs, cross_neg_idxs], axis=1)
        else:
            neg_idxs = cross_neg_idxs

    negs = y_flat[:, neg_idxs.reshape(-1)]
    negs = negs.reshape(fsz, bsz, n_negatives + cross_sample_negatives, tsz)
    return jnp.transpose(negs, (2, 1, 0, 3))  # (n_neg_total, B, C, T)


# -----------------------------------------------------------------------------
# Full forward pass.
# -----------------------------------------------------------------------------
def wav2vec_predictions_forward(
    x, y, weight, bias, key, *, prediction_steps, n_negatives,
    cross_sample_negatives, sample_distance, offset, balanced_classes, infonce,
):
    bsz, in_dim, tsz = x.shape

    proj_steps_all = project_to_steps(x, weight, bias, prediction_steps)  # (S,B,T,C)
    # TODO(synk): nn.Dropout treated as identity (eval/inference mode).

    negs = sample_negatives(key, y, n_negatives, cross_sample_negatives, sample_distance)
    targets = jnp.concatenate([y[None], negs], axis=0)  # (copies, B, C, T)
    copies = targets.shape[0]
    steps = min(prediction_steps, tsz - offset)

    proj_steps = proj_steps_all[:steps]                  # (steps, B, T, C)
    tsz_pad = tsz + steps + offset
    targets_t = jnp.transpose(targets, (0, 1, 3, 2))     # (copies, B, T, C)
    targets_pad = jnp.pad(targets_t, ((0, 0), (0, 0), (0, tsz_pad - tsz), (0, 0)))

    scores = compute_scores(proj_steps, targets_pad, offset, tsz)  # (steps, copies, B, T)

    chunks, label_chunks, weight_chunks = [], [], []
    for i in range(steps):
        off_i = i + offset
        valid = tsz - off_i
        sc = scores[i, :, :, :valid]  # (copies, B, valid)
        if infonce:
            # einsum('bct,nbct->tbn').flatten()
            chunks.append(jnp.transpose(sc, (2, 1, 0)).reshape(-1))
        else:
            # einsum('bct,nbct->nbt').flatten()
            chunks.append(sc.reshape(-1))
            pos_num = valid * bsz
            n_total = copies * bsz * valid
            lab = jnp.zeros((n_total,), jnp.float32).at[:pos_num].set(1.0)
            label_chunks.append(lab)
            if balanced_classes:
                wt = (jnp.full((n_total,), 1.0 / n_negatives, jnp.float32)
                      .at[:pos_num].set(1.0))
                weight_chunks.append(wt)

    predictions = jnp.concatenate(chunks)
    if infonce:
        predictions = predictions.reshape(-1, copies)
        # torch.long -> int32 (JAX default integer width on TPU)
        labels = jnp.zeros((predictions.shape[0],), dtype=jnp.int32)
        return predictions, labels
    labels = jnp.concatenate(label_chunks)
    if balanced_classes:
        weights = jnp.concatenate(weight_chunks)
        return predictions, (labels, weights)
    return predictions, labels


# -----------------------------------------------------------------------------
# Pure-JAX reference (mirrors the torch einsum path; projection inputs are
# bf16-rounded to match the kernel's MXU input dtype, accumulation stays f32).
# -----------------------------------------------------------------------------
def reference_predictions(x, y, weight, bias, negs, prediction_steps, offset, infonce):
    bsz, in_dim, tsz = x.shape
    xb = x.astype(jnp.bfloat16).astype(jnp.float32)
    wb = weight.astype(jnp.bfloat16).astype(jnp.float32)
    proj = jnp.einsum("bit,ios->bots", xb, wb,
                      precision=jax.lax.Precision.HIGHEST) + bias[None, :, None, None]
    targets = jnp.concatenate([y[None], negs], axis=0)
    copies = targets.shape[0]
    steps = min(prediction_steps, tsz - offset)
    chunks = []
    for i in range(steps):
        off = i + offset
        xi = proj[:, :, : tsz - off, i]
        ti = targets[..., off:]
        if infonce:
            e = jnp.einsum("bct,nbct->tbn", xi, ti, precision=jax.lax.Precision.HIGHEST)
        else:
            e = jnp.einsum("bct,nbct->nbt", xi, ti, precision=jax.lax.Precision.HIGHEST)
        chunks.append(e.reshape(-1))
    preds = jnp.concatenate(chunks)
    if infonce:
        preds = preds.reshape(-1, copies)
    return preds


if __name__ == "__main__":
    # Small, forward-consistent shapes.
    bsz, in_dim, out_dim, tsz = 2, 16, 8, 16
    prediction_steps = 4
    n_negatives = 3
    cross_sample_negatives = 1
    sample_distance = None
    offset = 2

    root = jax.random.PRNGKey(0)
    kx, ky, kw, kb, kneg = jax.random.split(root, 5)

    x = jax.random.normal(kx, (bsz, in_dim, tsz), jnp.float32)
    y = jax.random.normal(ky, (bsz, out_dim, tsz), jnp.float32)
    # ConvTranspose2d weight (in, out, 1, S) with kH==1 squeezed.
    weight = 0.1 * jax.random.normal(kw, (in_dim, out_dim, prediction_steps), jnp.float32)
    bias = 0.1 * jax.random.normal(kb, (out_dim,), jnp.float32)

    copies = 1 + n_negatives + cross_sample_negatives
    steps = min(prediction_steps, tsz - offset)
    expected_numel = (bsz * copies * (tsz - offset + 1) * steps
                      - (steps + 1) * steps // 2 * copies * bsz)

    # Deterministic negatives (same key as the forward uses).
    negs = sample_negatives(kneg, y, n_negatives, cross_sample_negatives, sample_distance)

    # --- infonce path --------------------------------------------------------
    preds, labels = wav2vec_predictions_forward(
        x, y, weight, bias, kneg,
        prediction_steps=prediction_steps, n_negatives=n_negatives,
        cross_sample_negatives=cross_sample_negatives,
        sample_distance=sample_distance, offset=offset,
        balanced_classes=False, infonce=True)
    preds = jax.block_until_ready(preds)
    labels = jax.block_until_ready(labels)
    ref = reference_predictions(x, y, weight, bias, negs, prediction_steps, offset, True)
    assert preds.size == expected_numel, (preds.size, expected_numel)
    assert preds.shape == (expected_numel // copies, copies)
    assert labels.shape == (expected_numel // copies,)
    np.testing.assert_allclose(np.asarray(preds), np.asarray(ref), rtol=1e-3, atol=1e-3)

    # --- BCE path with balanced classes --------------------------------------
    preds2, (labels2, weights2) = wav2vec_predictions_forward(
        x, y, weight, bias, kneg,
        prediction_steps=prediction_steps, n_negatives=n_negatives,
        cross_sample_negatives=cross_sample_negatives,
        sample_distance=sample_distance, offset=offset,
        balanced_classes=True, infonce=False)
    preds2 = jax.block_until_ready(preds2)
    ref2 = reference_predictions(x, y, weight, bias, negs, prediction_steps, offset, False)
    assert preds2.shape == (expected_numel,)
    assert labels2.shape == (expected_numel,)
    assert weights2.shape == (expected_numel,)
    np.testing.assert_allclose(np.asarray(preds2), np.asarray(ref2), rtol=1e-3, atol=1e-3)

    print("KERNEL_OK")
</pallas_src>

<mosaic_0001>
module attributes {stable_mosaic.version = 11 : i64} {
  func.func @_proj_kernel(%arg0: i32, %arg1: i32, %arg2: memref<32x16xbf16, #tpu.memory_space<vmem>>, %arg3: memref<16x32xbf16, #tpu.memory_space<vmem>>, %arg4: memref<1x32xf32, #tpu.memory_space<vmem>>, %arg5: memref<32x32xf32, #tpu.memory_space<vmem>>) attributes {dimension_semantics = [#tpu.dimension_semantics<parallel>, #tpu.dimension_semantics<parallel>], iteration_bounds = array<i64: 1, 1>, scalar_prefetch = 0 : i64, scratch_operands = 0 : i64, tpu.core_type = #tpu.core_type<tc>, window_params = [{transform_indices = @transform_0, window_bounds = array<i64: 32, 16>}, {transform_indices = @transform_1, window_bounds = array<i64: 16, 32>}, {transform_indices = @transform_2, window_bounds = array<i64: 1, 32>}, {transform_indices = @transform_3, window_bounds = array<i64: 32, 32>}]} {
    %c0 = arith.constant 0 : index
    %c0_0 = arith.constant 0 : index
    %0 = vector.load %arg2[%c0, %c0_0] : memref<32x16xbf16, #tpu.memory_space<vmem>>, vector<32x16xbf16>
    %c0_1 = arith.constant 0 : index
    %c0_2 = arith.constant 0 : index
    %1 = vector.load %arg3[%c0_1, %c0_2] : memref<16x32xbf16, #tpu.memory_space<vmem>>, vector<16x32xbf16>
    %cst = arith.constant dense<0.000000e+00> : vector<32x32xf32>
    %2 = tpu.matmul %0, %1, %cst {dimension_numbers = #tpu.dot_dimension_numbers<[1], [0], [0], [1], [0, 0, 1, 1], [], []>} : vector<32x16xbf16>, vector<16x32xbf16>, vector<32x32xf32> -> vector<32x32xf32>
    %c0_3 = arith.constant 0 : index
    %c0_4 = arith.constant 0 : index
    %3 = vector.load %arg4[%c0_3, %c0_4] : memref<1x32xf32, #tpu.memory_space<vmem>>, vector<1x32xf32>
    %4 = vector.broadcast %3 : vector<1x32xf32> to vector<32x32xf32>
    %5 = arith.addf %2, %4 : vector<32x32xf32>
    %c0_5 = arith.constant 0 : index
    %c0_6 = arith.constant 0 : index
    %6 = vector.load %arg5[%c0_5, %c0_6] : memref<32x32xf32, #tpu.memory_space<vmem>>, vector<32x32xf32>
    tpu.vector_store %arg5[%c0_5, %c0_6], %5 {strides = array<i32>} : memref<32x32xf32, #tpu.memory_space<vmem>>, vector<32x32xf32>,
    return
  }
  func.func @transform_0(%arg0: i32, %arg1: i32) -> (i32, i32) {
    %c0_i32 = arith.constant 0 : i32
    %c0_i32_0 = arith.constant 0 : i32
    return %arg0, %c0_i32 : i32, i32
  }
  func.func @transform_1(%arg0: i32, %arg1: i32) -> (i32, i32) {
    %c0_i32 = arith.constant 0 : i32
    %c0_i32_0 = arith.constant 0 : i32
    return %c0_i32, %arg1 : i32, i32
  }
  func.func @transform_2(%arg0: i32, %arg1: i32) -> (i32, i32) {
    %c0_i32 = arith.constant 0 : i32
    %c0_i32_0 = arith.constant 0 : i32
    return %c0_i32, %arg1 : i32, i32
  }
  func.func @transform_3(%arg0: i32, %arg1: i32) -> (i32, i32) {
    %c0_i32 = arith.constant 0 : i32
    return %arg0, %arg1 : i32, i32
  }
}

</mosaic_0001>

<bundles_post_ra>
// kernel: tpu_custom_call.1
= control target key start
LH: loop header
LB: loop body
LE: loop exit
PB: predicated region body
PF: predicated region fallthrough
CT: control target
= control target key end

     0   :  { %vm45_vm0 = vcmask 130048   ;;  %s214_s0 = inlined_call_operand.vmem [shape: bf16[32,16], index: 0, kind: input, shape index: {}]   ;;  %s215_s1 = inlined_call_operand.vmem [shape: bf16[16,32], index: 1, kind: input, shape index: {}]   ;;  %s216_s2 = inlined_call_operand.vmem [shape: f32[1,32], index: 2, kind: input, shape index: {}]   ;;  %s217_s3 = inlined_call_operand.hbm [shape: f32[32,32], index: 3, kind: output, shape index: {}]  }
   0x1   :  { %v140_v0 = vld [vmem:[%s215_s1] sm:$0xff]   ;;  %v142_v2 = vld [vmem:[%s214_s0 + $0x8] sm:$0xff]  }
   0x2   :  { %v141_v1 = vld [vmem:[%s214_s0] sm:$0xff]   ;;  %131 = vmatprep.subr.bf16.mxu0 %v140_v0 }
   0x3   :  { %132 = vmatpush3.bf16.msra.mxu0 %v140_v0  ;;  %133 = vmatprep.mubr.msk.bf16.mxu0 %vm45_vm0, %v141_v1 }
   0x4   :  { %8 = vsyncpa [#allocation3], 0  ;;  %v122_v3 = vld [vmem:[%s216_s2] ss:$0 sm:$0xff]  ;;  %vm101_vm1 = vcmask 261120   ;;  %s167_s1 = smov [#allocation2]  }
   0x5   :  { %s111_s20 = sshll.u32 %s167_s1, 4  ;;  %s112_s20 = int_to_ptr.vmem [resolvable:$true] %s111_s20 }
   0x6   :  { %134 = vmatmul.mubr.msk.bf16.vlgmr.msra.gmra.mrb[0].mxu0 %vm45_vm0, %v142_v2  ;;  %s143_s0 = scalar_lea.vmem %s112_s20, 512  ;;  %p148_p1 = scmp.lt.s32.totalorder %s112_s20, %s112_s20 }
   0x7   :  { %p144_p0 = scmp.ne.s32.totalorder %s112_s20, %s143_s0  ;;  %p149_p2 = scmp.lt.s32.totalorder %s143_s0, %s143_s0 }
   0x9   :  { %p150_p3 = por %p149_p2, %p148_p1 }
   0xb   :  { %p151_p4 = pnand %p150_p3, %p144_p0 }
  0xd9   :  { %v135_v4 = vpop.f32.mrb[0].mxu0 }
  0xda   :  { %v95_v5 = vadd.f32 %v135_v4, %v122_v3  ;;  %v86_v6 = vpop.f32.mrb[1].mxu0 }
  0xdb   :  { %v87_v7 = vadd.f32 %v122_v3, %v86_v6  ;;  %v136_v8 = vpop.f32.mrb[2].mxu0 }
  0xdc   :  { %104 = vst.msk [vmem:[#allocation2 + $0x10] sm:$0xff] %vm101_vm1, %v95_v5  ;;  %v98_v9 = vadd.f32 %v136_v8, %v122_v3  ;;  %v89_v10 = vpop.f32.mrb[3].mxu0 }
  0xdd   :  { %102 = vst.msk [vmem:[#allocation2] sm:$0xff] %vm101_vm1, %v87_v7  ;;  %v90_v11 = vadd.f32 %v122_v3, %v89_v10 }
  0xde   :  { %105 = vst.msk [vmem:[#allocation2 + $0x18] sm:$0xff] %vm101_vm1, %v98_v9 }
  0xdf   :  { %103 = vst.msk [vmem:[#allocation2 + $0x8] sm:$0xff] %vm101_vm1, %v90_v11 }
  0xe0   :  { %154 = shalt.err (!%p151_p4)
}
  0xe1   :  { %s155_s22 = scalar_lea.hbm %s217_s3, 512 }
  0xe2   :  { %p156_p5 = scmp.ne.s32.totalorder %s217_s3, %s155_s22  ;;  %p159_p6 = scmp.lt.u32.totalorder %s155_s22, %s217_s3 }
  0xe4   :  { %p161_p7 = pnand %p159_p6, %p156_p5 }
  0xe6   :  { %164 = shalt.err (!%p161_p7)
}
  0xe7   :  { %s168_s27 = smov 128   ;;  %s169_s28 = smov 8  }
  0xe8   :  { %117 = dma.vmem_to_hbm [thread:$0]  %s112_s20, 512, %s217_s3, [#allocation3], %s168_s27, %s168_s27, %s169_s28  }
  0xe9   :  { %165 = dma.done.wait [#allocation3], 512  }
  0xea   :  { %166 = vsyncadd [#allocation3], 4294966784 }
  0xeb   :  { %121 = vsyncpa [#allocation3], 1 }

</bundles_post_ra>
